<compile_context>
chip_gen: v5e
topology: v5e:2x2
jax: 0.10.0
libtpu: 0.0.40
codegen_flags: <defaults>
</compile_context>

<pallas_src>
import jax
import jax.numpy as jnp
from jax.experimental import pallas as pl
from jax.experimental.pallas import tpu as pltpu

# Deterministic parameters from HLR.init_w = [2.5819, -0.8674, 2.7245]
INIT_W = (2.5819, -0.8674)
INIT_B = 2.7245

LANES = 128            # vreg lane width
MAX_TILE_ROWS = 4096   # (4096,128) f32 block = 2 MiB/stream; 12 MiB live total
SMALL_N = 2048         # below this, plain XLA fusion beats kernel launch cost


def _align_up(v, m):
    return (v + m - 1) // m * m


def hlr_kernel(wb_ref, t_ref, s_ref, o_ref):
    # Scalars from SMEM: one scalar load each, broadcast for free on the VPU.
    w0 = wb_ref[0]
    w1 = wb_ref[1]
    b = wb_ref[2]
    # Pure VPU FMA + EUP exp2 (MXU is useless for K=2, N_out=1).
    t = t_ref[...].astype(jnp.float32)
    s = s_ref[...].astype(jnp.float32)
    o_ref[...] = jnp.exp2(t * w0 + s * w1 + b)


def _run_slabs(t2d, s2d, weight, bias, tile_rows):
    """t2d, s2d: (rows, 128) lane-dense slabs -> (rows, 128) f32 output."""
    rows = t2d.shape[0]
    wb = jnp.concatenate(
        [jnp.reshape(weight, (-1,)).astype(jnp.float32),
         jnp.reshape(bias, (-1,)).astype(jnp.float32)])      # [w0, w1, b]
    grid = (pl.cdiv(rows, tile_rows),)                        # ragged last block OK
    return pl.pallas_call(
        hlr_kernel,
        out_shape=jax.ShapeDtypeStruct((rows, LANES), jnp.float32),
        grid=grid,
        in_specs=[
            pl.BlockSpec(memory_space=pltpu.MemorySpace.SMEM),   # [w0, w1, b]
            pl.BlockSpec((tile_rows, LANES), lambda i: (i, 0)),  # t slab
            pl.BlockSpec((tile_rows, LANES), lambda i: (i, 0)),  # s slab
        ],
        out_specs=pl.BlockSpec((tile_rows, LANES), lambda i: (i, 0)),
        compiler_params=pltpu.CompilerParams(
            dimension_semantics=("parallel",)),
    )(wb, t2d, s2d)


def _plan(n, dtype):
    """Return (rows, n_pad, tile_rows) for a batch of n samples."""
    sub = 16 if dtype == jnp.bfloat16 else 8          # bf16 native tile is (16,128)
    rows = _align_up(pl.cdiv(n, LANES), sub)
    n_pad = rows * LANES
    # Big blocks for HBM-roofline, but keep >= 2 grid steps when possible so the
    # "parallel" axis can shard across v7x's two TensorCores.
    tile_rows = max(sub, min(MAX_TILE_ROWS, _align_up(pl.cdiv(rows, 2), sub)))
    return rows, n_pad, tile_rows


def _pad1d(v, n_pad):
    return v if v.shape[0] == n_pad else jnp.pad(v, (0, n_pad - v.shape[0]))


def hlr_forward(x, weight, bias):
    """x: (N, 2) f32/bf16; weight: (1, 2); bias: (1,)  ->  (N, 1) f32."""
    n = x.shape[0]
    if x.dtype not in (jnp.float32, jnp.bfloat16):
        x = x.astype(jnp.float32)

    if n < SMALL_N:
        # Small-N fast path: one XLA fusion; kernel launch + padding would dominate.
        return jnp.exp2(x.astype(jnp.float32) @ weight.astype(jnp.float32).T
                        + bias.astype(jnp.float32)[None, :])

    rows, n_pad, tile_rows = _plan(n, x.dtype)
    # AoS -> SoA deinterleave: pad + column split fuse into a single XLA pass.
    # TODO(synk): callers holding contiguous t/s should call hlr_forward_soa and
    # skip this extra HBM pass entirely.
    xp = x if n_pad == n else jnp.pad(x, ((0, n_pad - n), (0, 0)))
    t2d = xp[:, 0].reshape(rows, LANES)
    s2d = xp[:, 1].reshape(rows, LANES)

    out2d = _run_slabs(t2d, s2d, weight, bias, tile_rows)
    # Layout plumbing only; the [:n] slice fuses into downstream consumers.
    return out2d.reshape(n_pad, 1)[:n]


def hlr_forward_soa(t, s, weight, bias):
    """SoA entry point: t, s are contiguous (N,) arrays (no deinterleave pass)."""
    n = t.shape[0]
    if t.dtype not in (jnp.float32, jnp.bfloat16):
        t = t.astype(jnp.float32)
        s = s.astype(jnp.float32)
    if n < SMALL_N:
        w = weight.astype(jnp.float32).reshape(-1)
        return jnp.exp2(t.astype(jnp.float32) * w[0] + s.astype(jnp.float32) * w[1]
                        + bias.astype(jnp.float32).reshape(())).reshape(n, 1)
    rows, n_pad, tile_rows = _plan(n, t.dtype)
    t2d = _pad1d(t, n_pad).reshape(rows, LANES)
    s2d = _pad1d(s, n_pad).reshape(rows, LANES)
    out2d = _run_slabs(t2d, s2d, weight, bias, tile_rows)
    return out2d.reshape(n_pad, 1)[:n]


if __name__ == "__main__":
    key = jax.random.PRNGKey(0)
    weight = jnp.array([list(INIT_W)], dtype=jnp.float32)   # (1, 2)
    bias = jnp.array([INIT_B], dtype=jnp.float32)           # (1,)

    def ref_fn(x):
        return jnp.exp2(x @ weight.T + bias[None, :])

    # 1) Module-scale demo (N=8): small-N fast path.
    k1, k2 = jax.random.split(key)
    x_small = jax.random.uniform(k1, (8, 2), dtype=jnp.float32, minval=0.0, maxval=2.0)
    out_small = jax.block_until_ready(hlr_forward(x_small, weight, bias))
    assert out_small.shape == (8, 1)
    assert jnp.allclose(out_small, ref_fn(x_small), rtol=1e-5, atol=1e-5)

    # 2) Kernel path (N=5000: ragged last block, 2 grid steps).
    x_big = jax.random.uniform(k2, (5000, 2), dtype=jnp.float32, minval=0.0, maxval=2.0)
    out_big = jax.block_until_ready(hlr_forward(x_big, weight, bias))
    assert out_big.shape == (5000, 1)
    assert jnp.allclose(out_big, ref_fn(x_big), rtol=1e-5, atol=1e-5)

    # 3) SoA entry point (skips the AoS deinterleave pass).
    out_soa = jax.block_until_ready(
        hlr_forward_soa(x_big[:, 0], x_big[:, 1], weight, bias))
    assert jnp.allclose(out_soa, ref_fn(x_big), rtol=1e-5, atol=1e-5)

    print("KERNEL_OK")
</pallas_src>

<mosaic_0001>
module attributes {stable_mosaic.version = 11 : i64} {
  func.func @hlr_kernel(%arg0: i32, %arg1: memref<3xf32, #tpu.memory_space<smem>>, %arg2: memref<24x128xf32, #tpu.memory_space<vmem>>, %arg3: memref<24x128xf32, #tpu.memory_space<vmem>>, %arg4: memref<24x128xf32, #tpu.memory_space<vmem>>) attributes {dimension_semantics = [#tpu.dimension_semantics<parallel>], iteration_bounds = array<i64: 2>, scalar_prefetch = 0 : i64, scratch_operands = 0 : i64, tpu.core_type = #tpu.core_type<tc>, window_params = [{transform_indices = @transform_0, window_bounds = array<i64: 3>}, {transform_indices = @transform_1, window_bounds = array<i64: 24, 128>}, {transform_indices = @transform_2, window_bounds = array<i64: 24, 128>}, {transform_indices = @transform_3, window_bounds = array<i64: 24, 128>}]} {
    %c0 = arith.constant 0 : index
    %0 = memref.load %arg1[%c0] : memref<3xf32, #tpu.memory_space<smem>>
    %c1 = arith.constant 1 : index
    %1 = memref.load %arg1[%c1] : memref<3xf32, #tpu.memory_space<smem>>
    %c2 = arith.constant 2 : index
    %2 = memref.load %arg1[%c2] : memref<3xf32, #tpu.memory_space<smem>>
    %c0_0 = arith.constant 0 : index
    %c0_1 = arith.constant 0 : index
    %3 = vector.load %arg2[%c0_0, %c0_1] : memref<24x128xf32, #tpu.memory_space<vmem>>, vector<24x128xf32>
    %c0_2 = arith.constant 0 : index
    %c0_3 = arith.constant 0 : index
    %4 = vector.load %arg3[%c0_2, %c0_3] : memref<24x128xf32, #tpu.memory_space<vmem>>, vector<24x128xf32>
    %5 = vector.broadcast %0 : f32 to vector<24x128xf32>
    %6 = arith.mulf %3, %5 : vector<24x128xf32>
    %7 = vector.broadcast %1 : f32 to vector<24x128xf32>
    %8 = arith.mulf %4, %7 : vector<24x128xf32>
    %9 = arith.addf %6, %8 : vector<24x128xf32>
    %10 = vector.broadcast %2 : f32 to vector<24x128xf32>
    %11 = arith.addf %9, %10 : vector<24x128xf32>
    %12 = math.exp2 %11 : vector<24x128xf32>
    %c0_4 = arith.constant 0 : index
    %c0_5 = arith.constant 0 : index
    %13 = vector.load %arg4[%c0_4, %c0_5] : memref<24x128xf32, #tpu.memory_space<vmem>>, vector<24x128xf32>
    tpu.vector_store %arg4[%c0_4, %c0_5], %12 {strides = array<i32>} : memref<24x128xf32, #tpu.memory_space<vmem>>, vector<24x128xf32>,
    return
  }
  func.func @transform_0(%arg0: i32) -> i32 {
    %c0_i32 = arith.constant 0 : i32
    %c0_i32_0 = arith.constant 0 : i32
    return %c0_i32 : i32
  }
  func.func @transform_1(%arg0: i32) -> (i32, i32) {
    %c0_i32 = arith.constant 0 : i32
    %c0_i32_0 = arith.constant 0 : i32
    return %arg0, %c0_i32 : i32, i32
  }
  func.func @transform_2(%arg0: i32) -> (i32, i32) {
    %c0_i32 = arith.constant 0 : i32
    %c0_i32_0 = arith.constant 0 : i32
    return %arg0, %c0_i32 : i32, i32
  }
  func.func @transform_3(%arg0: i32) -> (i32, i32) {
    %c0_i32 = arith.constant 0 : i32
    %c0_i32_0 = arith.constant 0 : i32
    return %arg0, %c0_i32 : i32, i32
  }
}

</mosaic_0001>

<bundles_post_ra>
// kernel: tpu_custom_call.1
= control target key start
LH: loop header
LB: loop body
LE: loop exit
PB: predicated region body
PF: predicated region fallthrough
CT: control target
= control target key end

     0   :  { %s996_s0 = inlined_call_operand.hbm [shape: f32[3], index: 0, kind: input, shape index: {}]   ;;  %s997_s1 = inlined_call_operand.hbm [shape: f32[40,128], index: 1, kind: input, shape index: {}]   ;;  %s998_s2 = inlined_call_operand.hbm [shape: f32[40,128], index: 2, kind: input, shape index: {}]   ;;  %s999_s3 = inlined_call_operand.hbm [shape: f32[40,128], index: 3, kind: output, shape index: {}]  }
   0x1   :  { %1002 = sst [smem:[#allocation14_spill]] %s996_s0 }
   0x2   :  { %8 = vsyncpa [#allocation5], 0 }
   0x3   :  { %9 = vsyncpa [#allocation3], 0 }
   0x4   :  { %11 = vsyncpa [#allocation3 + $0x1], 0 }
   0x5   :  { %12 = vsyncpa [#allocation8], 0 }
   0x6   :  { %14 = vsyncpa [#allocation8 + $0x1], 0 }
   0x7   :  { %15 = vsyncpa [#allocation4], 0 }
   0x8   :  { %17 = vsyncpa [#allocation4 + $0x1], 0  ;;  %s741_s12 = smov 0   ;;  %s743_s13 = smov 0  }
   0x9   :  { %s745_s14 = smov 0   ;;  %s747_s15 = smov 0  }
   0xa LB: > { %s762_s16 = sadd.s32 4294967295, %s709_s15   ;;  %s437_s17 = sadd.s32 4294967294, %s709_s15   ;;  %s709_s15 = sphi %s747_s15, %s1020_s15   ;;  %s705_s14 = sphi %s745_s14, %s1019_s14   ;;  %s701_s13 = sphi %s743_s13, %s1018_s13   ;;  %s697_s12 = sphi %s741_s12, %s1017_s12  }
   0xb   : > { %s766_s18 = sadd.s32 1, %s709_s15   ;;  %s51_s19 = sadd.s32 1, %s705_s14 }
   0xc   : > { %s48_s20 = ssub.s32 %s709_s15, %s766_s18  ;;  %p58_p0 = scmp.ne.s32.totalorder %s705_s14, %s701_s13 }
   0xd   : > { %p49_p1 = scmp.eq.s32.totalorder %s48_s20, 0  ;;  %p59_p2 = scmp.eq.s32.totalorder %s709_s15, 0 }
   0xe   : > { %p64_p3 = scmp.ne.s32.totalorder %s701_s13, %s697_s12  ;;  %p1001_p4 = scmp.eq.s32.totalorder %s762_s16, 0 }
   0xf   : > { %s778_s21 = scalar_select %p49_p1, %s705_s14, %s51_s19  }
  0x10   : > { %p780_p5 = por %p59_p2, %p58_p0  ;;  %p786_p6 = por %p1001_p4, %p64_p3 }
  0x11   : > { %p114_p7 = scmp.eq.s32.totalorder %s762_s16, 1  ;;  %p120_p8 = scmp.eq.s32.totalorder %s437_s17, 1 }
  0x12   : > { %p438_p9 = scmp.ge.s32.totalorder %s709_s15, 1  ;;  %p127_p10 = scmp.lt.s32.totalorder %s709_s15, 3 }
  0x13   : > { %p793_p11 = por %p114_p7, %p58_p0  ;;  %p797_p12 = por %p120_p8, %p64_p3 }
  0x14   : > { %p801_p13 = pnand %p438_p9, %p127_p10  ;;  %s1008_s0 = sld [smem:[#allocation14_spill]] }
  0x15   : > { %s1005_s24 = scalar_select %p793_p11, 1, 0 }
  0x16   : > { %s1006_s25 = scalar_select %p797_p12, 1, 0 }
  0x17   : > { %p475_p1 = pneg %p801_p13  ;;  %s711_s30 = smov [#allocation2]  }
  0x18   : > { %p1000_p2 = scmp.ge.s32.totalorder %s709_s15, 2 }
  0x19   : > { %p476_p0 = pnand %p475_p1, %p1001_p4 }
  0x1a   : > { %s139_s29 = sshll.u32 %s1008_s0, 4  ;;  %146 = sbr.rel (%p1000_p2) target bundleno = 107 (0x6b), region = 20  ;;  %s140_s29 = int_to_ptr.hbm [resolvable:$true] %s139_s29 }
  0x1b   : > { %478 = dma.hbm_to_smem (!%p476_p0), %s140_s29, 16, %s711_s30, [#allocation5]  }
  0x1f   : > { %149 = sbr.rel (!%p780_p5) target bundleno = 69 (0x45), region = 24  ;;  %s150_s4 = sand.u32 (%p780_p5), 1, %s705_s14  }
  0x20   : > { %s155_s5 = smul.u32 (%p780_p5), 3, %s709_s15  ;;  %s822_s11 = scalar_lea.sflag (%p780_p5), [#allocation3], %s150_s4 }
  0x21   : > { %s465_s6 = smul.u32 (%p780_p5), 24, %s150_s4 }
  0x22   : > { %s156_s7 = ssub.s32 (%p780_p5), 5, %s155_s5 }
  0x23   : > { %p157_p3 = scmp.lt.s32.totalorder (%p780_p5), %s156_s7, 3  ;;  %s154_s17 = scalar_lea.vmem (%p780_p5), [#allocation6], %s465_s6 }
  0x25   : > { %s1022_s7 = smov (!%p157_p3, %s156_s7), 3 }
  0x26   : > { %s441_s8 = sshll.u32 %s1022_s7, 3 }
  0x27   : > { %s160_s9 = ssub.s32 24, %s441_s8 }
  0x28   : > { %s161_s10 = sshll.u32 %s160_s9, 4 }
  0x29   : > { %162 = vsyncadd %s822_s11, %s161_s10  ;;  %p825_p7 = scmp.ne.s32.totalorder %s441_s8, 0  ;;  %s462_s20 = smul.u32 24, %s709_s15 }
  0x2a   : > { %s830_s27 = sshll.u32 %s154_s17, 4  ;;  %s445_s28 = sshll.u32 %s1022_s7, 7  ;;  %s170_s27 = int_to_ptr.vmem [resolvable:$true] %s830_s27 }
  0x2b   : > { %s165_s4 = scalar_lea.hbm %s997_s1, %s462_s20  ;;  %s548_s8 = sshrl.u32 %s445_s28, 4 }
  0x2c   : > { %s167_s5 = sshll.u32 %s165_s4, 4  ;;  %s557_s0 = scalar_lea.hbm %s997_s1, 40  ;;  %s837_s5 = int_to_ptr.hbm [resolvable:$true] %s167_s5 }
  0x2d   : > { %s546_s6 = sshra.s32 %s837_s5, 4  ;;  %s547_s6 = int_to_ptr.hbm [resolvable:$true] %s546_s6 }
  0x2e   : > { %s553_s9 = scalar_lea.hbm %s547_s6, %s548_s8  ;;  %p558_p1 = scmp.lt.s32.totalorder %s547_s6, %s997_s1 }
  0x2f   : > { %p554_p8 = scmp.ne.s32.totalorder %s547_s6, %s553_s9  ;;  %p559_p0 = scmp.lt.s32.totalorder %s557_s0, %s553_s9 }
  0x31   : > { %p555_p9 = pnand %p554_p8, %p825_p7  ;;  %p560_p3 = por %p559_p0, %p558_p1 }
  0x33   : > { %p556_p10 = pneg %p555_p9 }
  0x35   : > { %p561_p2 = pnand %p560_p3, %p556_p10 }
  0x37   : > { %564 = shalt.err (!%p561_p2)
}
  0x38   : > { %s565_s30 = sshra.s32 %s170_s27, 4  ;;  %s712_s10 = smov [#allocation6]   ;;  %s566_s30 = int_to_ptr.vmem [resolvable:$true] %s565_s30 }
  0x39   : > { %s572_s4 = scalar_lea.vmem %s566_s30, %s548_s8  ;;  %s576_s17 = scalar_lea.vmem %s712_s10, 48 }
  0x3a   : > { %p573_p8 = scmp.ne.s32.totalorder %s566_s30, %s572_s4  ;;  %p578_p12 = scmp.lt.s32.totalorder %s576_s17, %s572_s4 }
  0x3c   : > { %p574_p9 = pnand %p573_p8, %p825_p7 }
  0x3e   : > { %p575_p4 = pneg %p574_p9 }
  0x40   : > { %p580_p11 = pnand %p578_p12, %p575_p4 }
  0x42   : > { %583 = shalt.err (!%p580_p11)
}
  0x43   : > { %s713_s6 = smov 128   ;;  %s714_s0 = smov 8  }
  0x44   : > { %175 = dma.hbm_to_vmem [thread:$0]  (%p825_p7), %s837_s5, %s445_s28, %s170_s27, %s822_s11, %s713_s6, %s713_s6, %s714_s0  }
  0x45 PF: > { %178 = sbr.rel (!%p780_p5) target bundleno = 107 (0x6b), region = 28  ;;  %s179_s8 = sand.u32 (%p780_p5), 1, %s705_s14  }
  0x46   : > { %s184_s9 = smul.u32 (%p780_p5), 3, %s709_s15  ;;  %s869_s10 = scalar_lea.sflag (%p780_p5), [#allocation8], %s179_s8 }
  0x47   : > { %s466_s29 = smul.u32 (%p780_p5), 24, %s179_s8 }
  0x48   : > { %s185_s20 = ssub.s32 (%p780_p5), 5, %s184_s9 }
  0x49   : > { %p186_p4 = scmp.lt.s32.totalorder (%p780_p5), %s185_s20, 3  ;;  %s183_s7 = scalar_lea.vmem (%p780_p5), [#allocation7], %s466_s29 }
  0x4b   : > { %s1024_s20 = smov (!%p186_p4, %s185_s20), 3 }
  0x4c   : > { %s446_s30 = sshll.u32 %s1024_s20, 3 }
  0x4d   : > { %s189_s4 = ssub.s32 24, %s446_s30 }
  0x4e   : > { %s190_s19 = sshll.u32 %s189_s4, 4 }
  0x4f   : > { %191 = vsyncadd %s869_s10, %s190_s19  ;;  %p872_p5 = scmp.ne.s32.totalorder %s446_s30, 0  ;;  %s463_s11 = smul.u32 24, %s709_s15 }
  0x50   : > { %s877_s27 = sshll.u32 %s183_s7, 4  ;;  %s450_s28 = sshll.u32 %s1024_s20, 7  ;;  %s199_s27 = int_to_ptr.vmem [resolvable:$true] %s877_s27 }
  0x51   : > { %s194_s6 = scalar_lea.hbm %s998_s2, %s463_s11  ;;  %s587_s9 = sshrl.u32 %s450_s28, 4 }
  0x52   : > { %s196_s0 = sshll.u32 %s194_s6, 4  ;;  %s596_s19 = scalar_lea.hbm %s998_s2, 40  ;;  %s884_s0 = int_to_ptr.hbm [resolvable:$true] %s196_s0 }
  0x53   : > { %s585_s8 = sshra.s32 %s884_s0, 4  ;;  %s586_s8 = int_to_ptr.hbm [resolvable:$true] %s585_s8 }
  0x54   : > { %s592_s29 = scalar_lea.hbm %s586_s8, %s587_s9  ;;  %p597_p7 = scmp.lt.s32.totalorder %s586_s8, %s998_s2 }
  0x55   : > { %p593_p11 = scmp.ne.s32.totalorder %s586_s8, %s592_s29  ;;  %p598_p10 = scmp.lt.s32.totalorder %s596_s19, %s592_s29 }
  0x57   : > { %p594_p12 = pnand %p593_p11, %p872_p5  ;;  %p599_p1 = por %p598_p10, %p597_p7 }
  0x59   : > { %p595_p2 = pneg %p594_p12 }
  0x5b   : > { %p600_p0 = pnand %p599_p1, %p595_p2 }
  0x5d   : > { %603 = shalt.err (!%p600_p0)
}
  0x5e   : > { %s604_s5 = sshra.s32 %s199_s27, 4  ;;  %s715_s6 = smov [#allocation7]   ;;  %s605_s5 = int_to_ptr.vmem [resolvable:$true] %s604_s5 }
  0x5f   : > { %s611_s17 = scalar_lea.vmem %s605_s5, %s587_s9  ;;  %s615_s30 = scalar_lea.vmem %s715_s6, 48 }
  0x60   : > { %p612_p3 = scmp.ne.s32.totalorder %s605_s5, %s611_s17  ;;  %p617_p4 = scmp.lt.s32.totalorder %s615_s30, %s611_s17 }
  0x62   : > { %p613_p8 = pnand %p612_p3, %p872_p5 }
  0x64   : > { %p614_p9 = pneg %p613_p8 }
  0x66   : > { %p619_p11 = pnand %p617_p4, %p614_p9 }
  0x68   : > { %622 = shalt.err (!%p619_p11)
}
  0x69   : > { %s716_s8 = smov 128   ;;  %s717_s29 = smov 8  }
  0x6a   : > { %204 = dma.hbm_to_vmem [thread:$0]  (%p872_p5), %s884_s0, %s450_s28, %s199_s27, %s869_s10, %s716_s8, %s716_s8, %s717_s29  }
  0x6b PF: > { %210 = sbr.rel (%p801_p13) target bundleno = 177 (0xb1), region = 32  ;;  %p1011_p12 = scmp.eq.s32.totalorder (!%p801_p13), %s762_s16, 0 }
  0x70   : > { %680 = dma.done.wait (%p1011_p12), [#allocation5], 16   ;;  %p1012_p2 = pmov %p1011_p12 }
  0x71   : > { %s916_s9 = sand.u32 1, %s701_s13  }
  0x72   : > { %682 = vsyncadd (%p1012_p2), [#allocation5], 4294967280  ;;  %s919_s22 = smul.u32 24, %s916_s9  ;;  %s218_s20 = scalar_lea.sflag [#allocation3], %s916_s9 }
  0x74   : > { %s221_s10 = scalar_lea.vmem [#allocation6], %s919_s22 }
  0x75   : > { %684 = dma.done.wait (%p786_p6), %s218_s20, 384  }
  0x76   : > { %686 = vsyncadd (%p786_p6), %s218_s20, 4294966912  ;;  %s228_s26 = scalar_lea.sflag [#allocation8], %s916_s9  ;;  %s231_s27 = scalar_lea.vmem [#allocation7], %s919_s22 }
  0x77   : > { %688 = dma.done.wait (%p786_p6), %s228_s26, 384  }
  0x78   : > { %690 = vsyncadd (%p786_p6), %s228_s26, 4294966912 }
  0x79   : > { %237 = sfence }
  0x7a   : > { %s276_s28 = sld [smem:[#allocation2]]  ;;  %v279_v0 = vld [vmem:[%s221_s10] sm:$0xff]  ;;  %v280_v1 = vld [vmem:[%s221_s10 + $0x8] sm:$0xff]  ;;  %v281_v2 = vld [vmem:[%s221_s10 + $0x10] sm:$0xff]  ;;  %s260_s23 = scalar_lea.vmem [#allocation9], %s919_s22 }
  0x7b   : > { %s453_s0 = sld [smem:[#allocation2 + $0x1]]  ;;  %v282_v3 = vld [vmem:[%s231_s27] sm:$0xff]  ;;  %v283_v4 = vld [vmem:[%s231_s27 + $0x8] sm:$0xff]  ;;  %v284_v5 = vld [vmem:[%s231_s27 + $0x10] sm:$0xff]  ;;  %s307_s19 = scalar_lea.sflag [#allocation4], %s916_s9 }
  0x7c   : > { %s454_s4 = sld [smem:[#allocation2 + $0x2]]  ;;  %p1013_p6 = scmp.ne.s32.totalorder %s1005_s24, 0 }
  0x7d   : > { %s314_s7 = smul.u32 (%p1013_p6), 3, %s762_s16 }
  0x7f   : > { %s315_s11 = ssub.s32 (%p1013_p6), 5, %s314_s7 }
  0x80   : > { %v285_v6 = vstv %s276_s28  ;;  %p316_p13 = scmp.lt.s32.totalorder (%p1013_p6), %s315_s11, 3 }
  0x81   : > { %v286_v7 = vmul.f32 %v285_v6, %v279_v0  ;;  %v289_v8 = vstv %s453_s0  ;;  %v287_v9 = vmul.f32 %v285_v6, %v280_v1  ;;  %v288_v10 = vmul.f32 %v285_v6, %v281_v2 }
  0x82   : > { %v290_v11 = vmul.f32 %v289_v8, %v282_v3  ;;  %v291_v12 = vmul.f32 %v289_v8, %v283_v4  ;;  %v292_v13 = vmul.f32 %v289_v8, %v284_v5  ;;  %v296_v14 = vstv %s454_s4 }
  0x84   : > { %v293_v15 = vadd.f32 %v290_v11, %v286_v7  ;;  %v294_v16 = vadd.f32 %v291_v12, %v287_v9  ;;  %v295_v17 = vadd.f32 %v292_v13, %v288_v10 }
  0x86   : > { %v297_v18 = vadd.f32 %v296_v14, %v293_v15  ;;  %v298_v19 = vadd.f32 %v296_v14, %v294_v16  ;;  %v299_v20 = vadd.f32 %v296_v14, %v295_v17 }
  0x88   : > { %525 = vpow2.f32 %v297_v18 }
  0x89   : > { %527 = vpow2.f32 %v298_v19 }
  0x8a   : > { %529 = vpow2.f32 %v299_v20 }
  0x8d   : > { %313 = sbr.rel (!%p1013_p6) target bundleno = 177 (0xb1), region = 48 }
  0x8e   : > { %v526_v21 = vpop.eup %525 }
  0x8f   : > { %v528_v22 = vpop.eup %527  ;;  %303 = vst [vmem:[%s260_s23] sm:$0xff] %v526_v21 }
  0x90   : > { %v530_v23 = vpop.eup %529  ;;  %304 = vst [vmem:[%s260_s23 + $0x8] sm:$0xff] %v528_v22 }
  0x91   : > { %305 = vst [vmem:[%s260_s23 + $0x10] sm:$0xff] %v530_v23 }
  0x92   : > { %s1026_s11 = smov (!%p316_p13, %s315_s11), 3 }
  0x93   : > { %s455_s5 = sshll.u32 %s1026_s11, 3 }
  0x94   : > { %s319_s17 = ssub.s32 24, %s455_s5 }
  0x95   : > { %s320_s6 = sshll.u32 %s319_s17, 4 }
  0x96   : > { %321 = vsyncadd %s307_s19, %s320_s6  ;;  %p943_p5 = scmp.ne.s32.totalorder %s455_s5, 0  ;;  %s464_s24 = smul.u32 24, %s762_s16 }
  0x97   : > { %s326_s8 = sshll.u32 %s260_s23, 4  ;;  %s459_s29 = sshll.u32 %s1026_s11, 7  ;;  %s952_s8 = int_to_ptr.vmem [resolvable:$true] %s326_s8 }
  0x98   : > { %s324_s10 = scalar_lea.hbm %s999_s3, %s464_s24  ;;  %s624_s27 = sshra.s32 %s952_s8, 4  ;;  %s625_s27 = int_to_ptr.vmem [resolvable:$true] %s624_s27 }
  0x99   : > { %s328_s26 = sshll.u32 %s324_s10, 4  ;;  %s626_s28 = sshrl.u32 %s459_s29, 4  ;;  %s954_s26 = int_to_ptr.hbm [resolvable:$true] %s328_s26 }
  0x9a   : > { %s631_s0 = scalar_lea.vmem %s625_s27, %s626_s28  ;;  %s718_s16 = smov [#allocation9]  }
  0x9b   : > { %p632_p7 = scmp.ne.s32.totalorder %s625_s27, %s631_s0  ;;  %s635_s4 = scalar_lea.vmem %s718_s16, 48 }
  0x9c   : > { %p637_p0 = scmp.lt.s32.totalorder %s635_s4, %s631_s0 }
  0x9d   : > { %p633_p10 = pnand %p632_p7, %p943_p5 }
  0x9f   : > { %p634_p1 = pneg %p633_p10 }
  0xa1   : > { %p639_p3 = pnand %p637_p0, %p634_p1 }
  0xa3   : > { %642 = shalt.err (!%p639_p3)
}
  0xa4   : > { %s643_s23 = sshra.s32 %s954_s26, 4  ;;  %s654_s6 = scalar_lea.hbm %s999_s3, 40  ;;  %s644_s23 = int_to_ptr.hbm [resolvable:$true] %s643_s23 }
  0xa5   : > { %s650_s7 = scalar_lea.hbm %s644_s23, %s626_s28  ;;  %p655_p11 = scmp.lt.s32.totalorder %s644_s23, %s999_s3 }
  0xa6   : > { %p651_p8 = scmp.ne.s32.totalorder %s644_s23, %s650_s7  ;;  %p656_p12 = scmp.lt.s32.totalorder %s654_s6, %s650_s7 }
  0xa8   : > { %p652_p9 = pnand %p651_p8, %p943_p5  ;;  %p657_p2 = por %p656_p12, %p655_p11 }
  0xaa   : > { %p653_p4 = pneg %p652_p9 }
  0xac   : > { %p658_p6 = pnand %p657_p2, %p653_p4 }
  0xae   : > { %661 = shalt.err (!%p658_p6)
}
  0xaf   : > { %s719_s20 = smov 128   ;;  %s720_s10 = smov 8  }
  0xb0   : > { %334 = dma.vmem_to_hbm [thread:$0]  (%p943_p5), %s952_s8, %s459_s29, %s954_s26, %s307_s19, %s719_s20, %s719_s20, %s720_s10  }
  0xb1 PF: > { %s343_s27 = sand.u32 1, %s697_s12   ;;  %p1015_p13 = scmp.ne.s32.totalorder %s1006_s25, 0 }
  0xb2   : > { %p1016_p7 = scmp.ge.s32.totalorder %s709_s15, 2  ;;  %s344_s28 = scalar_lea.sflag [#allocation4], %s343_s27 }
  0xb4   : > { %p480_p10 = pnand %p1016_p7, %p1015_p13 }
  0xb6   : > { %p481_p1 = pneg %p480_p10 }
  0xb8   : > { %692 = dma.done.wait (%p481_p1), %s344_s28, 384  }
  0xb9   : > { %694 = vsyncadd (%p481_p1), %s344_s28, 4294966912  ;;  %p20_p0 = scmp.ge.s32.totalorder %s766_s18, 4   ;;  %s1017_s12 = smov %s701_s13 }
  0xba   : > { %s1018_s13 = smov %s705_s14  ;;  %s1019_s14 = smov %s778_s21 }
  0xbb   : > { %s1020_s15 = smov %s766_s18  ;;  %22 = sbr.rel (!%p20_p0) target bundleno = 10 (0xa), region = 95 }
  0xc0   :  { %350 = vsyncpa [#allocation3], 1 }
  0xc1   :  { %352 = vsyncpa [#allocation3 + $0x1], 1 }
  0xc2   :  { %353 = vsyncpa [#allocation8], 1 }
  0xc3   :  { %355 = vsyncpa [#allocation8 + $0x1], 1 }
  0xc4   :  { %356 = vsyncpa [#allocation4], 1 }
  0xc5   :  { %358 = vsyncpa [#allocation4 + $0x1], 1 }
  0xc6   :  { %359 = vsyncpa [#allocation5], 1 }
  0xc7   :  { %361 = vsyncpa [#allocation5 + $0x1], 1 }

</bundles_post_ra>
